<compile_context>
chip_gen: v7x
topology: tpu7x:2x2x1
jax: 0.10.0
libtpu: 0.0.40
codegen_flags: <defaults>
</compile_context>

<pallas_src>
import functools

import jax
import jax.numpy as jnp
from jax.experimental import pallas as pl
from jax.experimental.pallas import tpu as pltpu

HIDDEN = 256
OUT = 2
OUT_PAD = 128     # fc3 padded width kept in VMEM only (clean MXU fill)
TB_MAX = 2048     # portable tile cap (fits v5e's 16 MiB scoped-VMEM default)


def _round_up(n, m):
    return ((n + m - 1) // m) * m


@functools.lru_cache(maxsize=None)
def _acc_dtype():
    """bf16 epilogues on bf16-native VPUs (v6e/v7x), f32 elsewhere (v5e etc.)."""
    try:
        kind = jax.devices()[0].device_kind.lower()
    except Exception:
        return jnp.float32
    return jnp.bfloat16 if ("v6" in kind or "v7" in kind) else jnp.float32


def mlp_kernel(x_ref, w1_ref, b1_ref, w2_ref, b2_ref, w3_ref, b3_ref, o_ref,
               *, acc_dtype):
    # fc1 + ReLU on the MXU (K=2 matmul), epilogue in acc_dtype.
    x = x_ref[...].astype(jnp.bfloat16)                       # (TB, 2)
    h1 = jnp.dot(x, w1_ref[...], preferred_element_type=acc_dtype)
    h1 = jnp.maximum(h1 + b1_ref[...], 0.0).astype(jnp.bfloat16)   # (TB, 256)

    # fc2 + ReLU: bf16 MXU matmul, epilogue in acc_dtype.
    h2 = jnp.dot(h1, w2_ref[...], preferred_element_type=acc_dtype)
    h2 = jnp.maximum(h2 + b2_ref[...], 0.0).astype(jnp.bfloat16)   # (TB, 256)

    # fc3 (no activation): padded to 128 cols in VMEM, f32 accumulation.
    out = jnp.dot(h2, w3_ref[...], preferred_element_type=jnp.float32)
    out = out + b3_ref[...]                                    # (TB, 128) f32

    # Only the 2 real columns are written back to HBM.
    o_ref[...] = out[:, :OUT].astype(o_ref.dtype)


@jax.jit
def mlp_forward(x, params):
    """Forward pass of the 2-256-256-2 MLP. x: (B, 2) f32 -> (B, 2) f32."""
    w1, b1, w2, b2, w3, b3 = params
    B = x.shape[0]
    acc_dtype = _acc_dtype()

    # Tile choice: multiple of 8, capped at TB_MAX, and sized so B >= 16 gives
    # at least 2 grid steps (v7x has 2 TensorCores sharing the parallel axis).
    tb = min(TB_MAX, max(8, _round_up(pl.cdiv(B, 2), 8)))
    b_pad = pl.cdiv(B, tb) * tb
    if b_pad != B:
        x = jnp.pad(x, ((0, b_pad - B), (0, 0)))

    # Resident-weight preprocessing: biases in epilogue dtype, fc3 padded to a
    # lane-dense 128-wide VMEM tile (output written back is still only 2 wide).
    b1c = b1.astype(acc_dtype)
    b2c = b2.astype(acc_dtype)
    w3p = jnp.pad(w3, ((0, 0), (0, OUT_PAD - OUT)))
    b3p = jnp.pad(b3, ((0, 0), (0, OUT_PAD - OUT)))

    grid = (b_pad // tb,)
    out = pl.pallas_call(
        functools.partial(mlp_kernel, acc_dtype=acc_dtype),
        out_shape=jax.ShapeDtypeStruct((b_pad, OUT), jnp.float32),
        grid=grid,
        in_specs=[
            pl.BlockSpec((tb, 2), lambda i: (i, 0)),            # x tile
            pl.BlockSpec((2, HIDDEN), lambda i: (0, 0)),        # w1 (resident)
            pl.BlockSpec((1, HIDDEN), lambda i: (0, 0)),        # b1 (resident)
            pl.BlockSpec((HIDDEN, HIDDEN), lambda i: (0, 0)),   # w2 (resident)
            pl.BlockSpec((1, HIDDEN), lambda i: (0, 0)),        # b2 (resident)
            pl.BlockSpec((HIDDEN, OUT_PAD), lambda i: (0, 0)),  # w3 padded (resident)
            pl.BlockSpec((1, OUT_PAD), lambda i: (0, 0)),       # b3 padded (resident)
        ],
        out_specs=pl.BlockSpec((tb, OUT), lambda i: (i, 0)),    # narrow (tb, 2) output
        compiler_params=pltpu.CompilerParams(
            dimension_semantics=("parallel",),
            vmem_limit_bytes=32 * 1024 * 1024),
    )(x, w1, b1c, w2, b2c, w3p, b3p)

    return out[:B]


def init_params(key):
    """Mirror torch.nn.Linear default init: U(-1/sqrt(fan_in), 1/sqrt(fan_in)).
    Weights stored as (in, out) in bf16; biases as (1, out) in f32."""
    dims = [(2, HIDDEN), (HIDDEN, HIDDEN), (HIDDEN, OUT)]
    params = []
    for fan_in, fan_out in dims:
        key, kw, kb = jax.random.split(key, 3)
        bound = 1.0 / jnp.sqrt(jnp.float32(fan_in))
        w = jax.random.uniform(kw, (fan_in, fan_out), jnp.float32, -bound, bound)
        b = jax.random.uniform(kb, (1, fan_out), jnp.float32, -bound, bound)
        params += [w.astype(jnp.bfloat16), b]
    return params


def reference_forward(x, params, acc_dtype):
    """Pure-JAX reference mirroring the kernel's numerics (same bf16 weights,
    same epilogue dtype, f32 fc3 accumulation + bias)."""
    w1, b1, w2, b2, w3, b3 = params
    xb = x.astype(jnp.bfloat16)
    h1 = jnp.dot(xb, w1, preferred_element_type=acc_dtype)
    h1 = jnp.maximum(h1 + b1.astype(acc_dtype), 0.0).astype(jnp.bfloat16)
    h2 = jnp.dot(h1, w2, preferred_element_type=acc_dtype)
    h2 = jnp.maximum(h2 + b2.astype(acc_dtype), 0.0).astype(jnp.bfloat16)
    out = jnp.dot(h2, w3, preferred_element_type=jnp.float32)
    return out + b3


if __name__ == "__main__":
    key = jax.random.PRNGKey(0)
    kp, kx1, kx2 = jax.random.split(key, 3)
    params = init_params(kp)

    # Small batch of 2-D "two moons"-like points (single small tile).
    x_small = jax.random.normal(kx1, (8, 2), jnp.float32)
    out_small = jax.block_until_ready(mlp_forward(x_small, params))
    ref_small = reference_forward(x_small, params, _acc_dtype())
    assert out_small.shape == (8, 2)
    assert jnp.allclose(out_small, ref_small, atol=1e-2, rtol=1e-2)

    # Non-multiple batch: exercises multiple grid steps (>=2, for v7x megacore),
    # batch padding, and resident-in-VMEM weights.
    x_multi = jax.random.normal(kx2, (300, 2), jnp.float32)
    out_multi = jax.block_until_ready(mlp_forward(x_multi, params))
    ref_multi = reference_forward(x_multi, params, _acc_dtype())
    assert out_multi.shape == (300, 2)
    assert jnp.allclose(out_multi, ref_multi, atol=1e-2, rtol=1e-2)

    print("KERNEL_OK")
</pallas_src>

<mosaic_0001>
module attributes {stable_mosaic.version = 11 : i64} {
  func.func @mlp_kernel(%arg0: i32, %arg1: memref<8x2xf32, #tpu.memory_space<vmem>>, %arg2: memref<2x256xbf16, #tpu.memory_space<vmem>>, %arg3: memref<1x256xf32, #tpu.memory_space<vmem>>, %arg4: memref<256x256xbf16, #tpu.memory_space<vmem>>, %arg5: memref<1x256xf32, #tpu.memory_space<vmem>>, %arg6: memref<256x128xbf16, #tpu.memory_space<vmem>>, %arg7: memref<1x128xf32, #tpu.memory_space<vmem>>, %arg8: memref<8x2xf32, #tpu.memory_space<vmem>>) attributes {dimension_semantics = [#tpu.dimension_semantics<parallel>], iteration_bounds = array<i64: 1>, scalar_prefetch = 0 : i64, scratch_operands = 0 : i64, tpu.core_type = #tpu.core_type<tc>, window_params = [{transform_indices = @transform_0, window_bounds = array<i64: 8, 2>}, {pipeline_mode = #tpu.pipeline_mode<synchronous>, transform_indices = @transform_1, window_bounds = array<i64: 2, 256>}, {pipeline_mode = #tpu.pipeline_mode<synchronous>, transform_indices = @transform_2, window_bounds = array<i64: 1, 256>}, {pipeline_mode = #tpu.pipeline_mode<synchronous>, transform_indices = @transform_3, window_bounds = array<i64: 256, 256>}, {pipeline_mode = #tpu.pipeline_mode<synchronous>, transform_indices = @transform_4, window_bounds = array<i64: 1, 256>}, {pipeline_mode = #tpu.pipeline_mode<synchronous>, transform_indices = @transform_5, window_bounds = array<i64: 256, 128>}, {pipeline_mode = #tpu.pipeline_mode<synchronous>, transform_indices = @transform_6, window_bounds = array<i64: 1, 128>}, {transform_indices = @transform_7, window_bounds = array<i64: 8, 2>}]} {
    %c0 = arith.constant 0 : index
    %c0_0 = arith.constant 0 : index
    %0 = vector.load %arg1[%c0, %c0_0] : memref<8x2xf32, #tpu.memory_space<vmem>>, vector<8x2xf32>
    %1 = arith.truncf %0 : vector<8x2xf32> to vector<8x2xbf16>
    %c0_1 = arith.constant 0 : index
    %c0_2 = arith.constant 0 : index
    %2 = vector.load %arg2[%c0_1, %c0_2] : memref<2x256xbf16, #tpu.memory_space<vmem>>, vector<2x256xbf16>
    %cst = arith.constant dense<0.000000e+00> : vector<8x256xf32>
    %3 = tpu.matmul %1, %2, %cst {dimension_numbers = #tpu.dot_dimension_numbers<[1], [0], [0], [1], [0, 0, 1, 1], [], []>} : vector<8x2xbf16>, vector<2x256xbf16>, vector<8x256xf32> -> vector<8x256xf32>
    %c0_3 = arith.constant 0 : index
    %c0_4 = arith.constant 0 : index
    %4 = vector.load %arg3[%c0_3, %c0_4] : memref<1x256xf32, #tpu.memory_space<vmem>>, vector<1x256xf32>
    %5 = vector.broadcast %4 : vector<1x256xf32> to vector<8x256xf32>
    %6 = arith.addf %3, %5 : vector<8x256xf32>
    %cst_5 = arith.constant 0.000000e+00 : f32
    %7 = vector.broadcast %cst_5 : f32 to vector<8x256xf32>
    %8 = arith.maximumf %6, %7 : vector<8x256xf32>
    %9 = arith.truncf %8 : vector<8x256xf32> to vector<8x256xbf16>
    %c0_6 = arith.constant 0 : index
    %c0_7 = arith.constant 0 : index
    %10 = vector.load %arg4[%c0_6, %c0_7] : memref<256x256xbf16, #tpu.memory_space<vmem>>, vector<256x256xbf16>
    %cst_8 = arith.constant dense<0.000000e+00> : vector<8x256xf32>
    %11 = tpu.matmul %9, %10, %cst_8 {dimension_numbers = #tpu.dot_dimension_numbers<[1], [0], [0], [1], [0, 0, 1, 1], [], []>} : vector<8x256xbf16>, vector<256x256xbf16>, vector<8x256xf32> -> vector<8x256xf32>
    %c0_9 = arith.constant 0 : index
    %c0_10 = arith.constant 0 : index
    %12 = vector.load %arg5[%c0_9, %c0_10] : memref<1x256xf32, #tpu.memory_space<vmem>>, vector<1x256xf32>
    %13 = vector.broadcast %12 : vector<1x256xf32> to vector<8x256xf32>
    %14 = arith.addf %11, %13 : vector<8x256xf32>
    %cst_11 = arith.constant 0.000000e+00 : f32
    %15 = vector.broadcast %cst_11 : f32 to vector<8x256xf32>
    %16 = arith.maximumf %14, %15 : vector<8x256xf32>
    %17 = arith.truncf %16 : vector<8x256xf32> to vector<8x256xbf16>
    %c0_12 = arith.constant 0 : index
    %c0_13 = arith.constant 0 : index
    %18 = vector.load %arg6[%c0_12, %c0_13] : memref<256x128xbf16, #tpu.memory_space<vmem>>, vector<256x128xbf16>
    %cst_14 = arith.constant dense<0.000000e+00> : vector<8x128xf32>
    %19 = tpu.matmul %17, %18, %cst_14 {dimension_numbers = #tpu.dot_dimension_numbers<[1], [0], [0], [1], [0, 0, 1, 1], [], []>} : vector<8x256xbf16>, vector<256x128xbf16>, vector<8x128xf32> -> vector<8x128xf32>
    %c0_15 = arith.constant 0 : index
    %c0_16 = arith.constant 0 : index
    %20 = vector.load %arg7[%c0_15, %c0_16] : memref<1x128xf32, #tpu.memory_space<vmem>>, vector<1x128xf32>
    %21 = vector.broadcast %20 : vector<1x128xf32> to vector<8x128xf32>
    %22 = arith.addf %19, %21 : vector<8x128xf32>
    %23 = vector.extract_strided_slice %22 {offsets = [0, 0], sizes = [8, 2], strides = [1, 1]} : vector<8x128xf32> to vector<8x2xf32>
    %c0_17 = arith.constant 0 : index
    %c0_18 = arith.constant 0 : index
    %24 = vector.load %arg8[%c0_17, %c0_18] : memref<8x2xf32, #tpu.memory_space<vmem>>, vector<8x2xf32>
    tpu.vector_store %arg8[%c0_17, %c0_18], %23 {strides = array<i32>} : memref<8x2xf32, #tpu.memory_space<vmem>>, vector<8x2xf32>,
    return
  }
  func.func @transform_0(%arg0: i32) -> (i32, i32) {
    %c0_i32 = arith.constant 0 : i32
    %c0_i32_0 = arith.constant 0 : i32
    return %arg0, %c0_i32 : i32, i32
  }
  func.func @transform_1(%arg0: i32) -> (i32, i32) {
    %c0_i32 = arith.constant 0 : i32
    %c0_i32_0 = arith.constant 0 : i32
    %c0_i32_1 = arith.constant 0 : i32
    return %c0_i32, %c0_i32_0 : i32, i32
  }
  func.func @transform_2(%arg0: i32) -> (i32, i32) {
    %c0_i32 = arith.constant 0 : i32
    %c0_i32_0 = arith.constant 0 : i32
    %c0_i32_1 = arith.constant 0 : i32
    return %c0_i32, %c0_i32_0 : i32, i32
  }
  func.func @transform_3(%arg0: i32) -> (i32, i32) {
    %c0_i32 = arith.constant 0 : i32
    %c0_i32_0 = arith.constant 0 : i32
    %c0_i32_1 = arith.constant 0 : i32
    return %c0_i32, %c0_i32_0 : i32, i32
  }
  func.func @transform_4(%arg0: i32) -> (i32, i32) {
    %c0_i32 = arith.constant 0 : i32
    %c0_i32_0 = arith.constant 0 : i32
    %c0_i32_1 = arith.constant 0 : i32
    return %c0_i32, %c0_i32_0 : i32, i32
  }
  func.func @transform_5(%arg0: i32) -> (i32, i32) {
    %c0_i32 = arith.constant 0 : i32
    %c0_i32_0 = arith.constant 0 : i32
    %c0_i32_1 = arith.constant 0 : i32
    return %c0_i32, %c0_i32_0 : i32, i32
  }
  func.func @transform_6(%arg0: i32) -> (i32, i32) {
    %c0_i32 = arith.constant 0 : i32
    %c0_i32_0 = arith.constant 0 : i32
    %c0_i32_1 = arith.constant 0 : i32
    return %c0_i32, %c0_i32_0 : i32, i32
  }
  func.func @transform_7(%arg0: i32) -> (i32, i32) {
    %c0_i32 = arith.constant 0 : i32
    %c0_i32_0 = arith.constant 0 : i32
    return %arg0, %c0_i32 : i32, i32
  }
}

</mosaic_0001>

<bundles_post_ra>
// kernel: mlp_forward.1
= control target key start
LH: loop header
LB: loop body
LE: loop exit
PB: predicated region body
PF: predicated region fallthrough
CT: control target
= control target key end

     0   :  { %v32_v0 = vlaneseq  ;;  %v690_v2 = vmov 1966171168   ;;  %v691_v4 = vmov 0   ;;  %vm69_vm0 = vcmask 1040384   ;;  %s901_s1 = inlined_call_operand.vmem [shape: bf16[2,256], index: 1, kind: input, shape index: {}]   ;;  %s902_s3 = inlined_call_operand.vmem [shape: bf16[256,256], index: 3, kind: input, shape index: {}]   ;;  %s903_s0 = inlined_call_operand.vmem [shape: f32[8,2], index: 0, kind: input, shape index: {}]   ;;  %s904_s5 = inlined_call_operand.vmem [shape: bf16[256,128], index: 5, kind: input, shape index: {}]   ;;  %s905_s2 = inlined_call_operand.vmem [shape: f32[1,256], index: 2, kind: input, shape index: {}]   ;;  %s906_s4 = inlined_call_operand.vmem [shape: f32[1,256], index: 4, kind: input, shape index: {}]   ;;  %s907_s6 = inlined_call_operand.vmem [shape: f32[1,128], index: 6, kind: input, shape index: {}]   ;;  %s908_s7 = inlined_call_operand.vmem [shape: f32[8,2], index: 7, kind: output, shape index: {}]  }
   0x1   :  { %v550_v1 = vld.sshfl [vmem:[%s901_s1] sm:$0x11 pattern:$0x75316420]  ;;  %v52_v3 = vunpack.c.l.s4 %v690_v2  ;;  %108 = vmatprep.mubr.bf16.mxu0 %v691_v4  ;;  %v626_v6 = vld [vmem:[%s902_s3 + $0x4] ss:$8 sps:$4 sm:$0xff]  }
   0x2   :  { %v735_v5 = vshrl.u32 %v32_v0, 7  ;;  %v50_v7 = vcombine.high %v550_v1, %v550_v1  ;;  %v628_v9 = vld [vmem:[%s902_s3] ss:$8 sps:$4 sm:$0xff]   ;;  %325 = vmatprep.subr.bf16.mxu1 %v626_v6  ;;  %v629_v10 = vld [vmem:[%s902_s3 + $0x14] ss:$8 sps:$4 sm:$0xff]   ;;  %vm65_vm1 = vcmask 15360  }
   0x3   :  { %v53_v8 = vunpack.c.0.s8 %v52_v3  ;;  %v27_v12 = vld [vmem:[%s903_s0] sm:$0xff]  ;;  %326 = vmatpush1.bf16.msra.mxu1 %v628_v9  ;;  %v631_v13 = vld [vmem:[%s902_s3 + $0x10] ss:$8 sps:$4 sm:$0xff]   ;;  %v635_v20 = vld [vmem:[%s902_s3 + $0x34] ss:$8 sps:$4 sm:$0xff]  }
   0x4   :  { %327 = vmatprep.subr.bf16.mxu1 %v629_v10  ;;  %v632_v14 = vld [vmem:[%s902_s3 + $0x24] ss:$8 sps:$4 sm:$0xff]   ;;  %v28_v18 = vpack.c.bf16 %v27_v12, %v27_v12  ;;  %v634_v19 = vld [vmem:[%s902_s3 + $0x20] ss:$8 sps:$4 sm:$0xff]   ;;  %v637_v21 = vld [vmem:[%s902_s3 + $0x30] ss:$8 sps:$4 sm:$0xff]  }
   0x5   :  { %v56_v11 = vsub.s32 %v53_v8, %v735_v5  ;;  %v638_v22 = vld [vmem:[%s902_s3 + $0x44] ss:$8 sps:$4 sm:$0xff]   ;;  %v640_v23 = vld [vmem:[%s902_s3 + $0x40] ss:$8 sps:$4 sm:$0xff]   ;;  %v641_v24 = vld [vmem:[%s902_s3 + $0x54] ss:$8 sps:$4 sm:$0xff]  }
   0x6   :  { %v643_v25 = vld [vmem:[%s902_s3 + $0x50] ss:$8 sps:$4 sm:$0xff]   ;;  %v644_v26 = vld [vmem:[%s902_s3 + $0x64] ss:$8 sps:$4 sm:$0xff]   ;;  %v646_v27 = vld [vmem:[%s902_s3 + $0x60] ss:$8 sps:$4 sm:$0xff]  }
   0x7   :  { %v64_v15 = vrot.slane %v50_v7, %v56_v11  ;;  %v57_v16 = vrot.slane %v550_v1, %v56_v11  ;;  %328 = vmatpush1.bf16.msra.mxu1 %v631_v13  ;;  %v647_v28 = vld [vmem:[%s902_s3 + $0x74] ss:$8 sps:$4 sm:$0xff]   ;;  %v649_v29 = vld [vmem:[%s902_s3 + $0x70] ss:$8 sps:$4 sm:$0xff]   ;;  %v650_v30 = vld [vmem:[%s902_s3 + $0x84] ss:$8 sps:$4 sm:$0xff]  }
   0x8   :  { %329 = vmatprep.subr.bf16.mxu1 %v632_v14  ;;  %v652_v31 = vld [vmem:[%s902_s3 + $0x80] ss:$8 sps:$4 sm:$0xff]   ;;  %v653_v32 = vld [vmem:[%s902_s3 + $0x94] ss:$8 sps:$4 sm:$0xff]   ;;  %v655_v33 = vld [vmem:[%s902_s3 + $0x90] ss:$8 sps:$4 sm:$0xff]  }
   0x9   :  { %551 = vmatprep.subr.msk.bf16.mxu0 %vm69_vm0, %v64_v15  ;;  %v71_v17 = vsel %vm69_vm0, %v57_v16, 0  ;;  %v656_v34 = vld [vmem:[%s902_s3 + $0xa4] ss:$8 sps:$4 sm:$0xff]   ;;  %v658_v35 = vld [vmem:[%s902_s3 + $0xa0] ss:$8 sps:$4 sm:$0xff]   ;;  %v678_v50 = vld [vmem:[%s904_s5 + $0x50] sm:$0xff]  }
   0xa   :  { %77 = vmatpush1.bf16.msra.mxu0 %v71_v17  ;;  %v659_v36 = vld [vmem:[%s902_s3 + $0xb4] ss:$8 sps:$4 sm:$0xff]   ;;  %v661_v37 = vld [vmem:[%s902_s3 + $0xb0] ss:$8 sps:$4 sm:$0xff]   ;;  %v662_v38 = vld [vmem:[%s902_s3 + $0xc4] ss:$8 sps:$4 sm:$0xff]  }
   0xb   :  { %330 = vmatpush1.bf16.msra.mxu1 %v634_v19  ;;  %v664_v39 = vld [vmem:[%s902_s3 + $0xc0] ss:$8 sps:$4 sm:$0xff]   ;;  %v665_v40 = vld [vmem:[%s902_s3 + $0xd4] ss:$8 sps:$4 sm:$0xff]   ;;  %v667_v41 = vld [vmem:[%s902_s3 + $0xd0] ss:$8 sps:$4 sm:$0xff]  }
   0xc   :  { %331 = vmatprep.subr.bf16.mxu1 %v635_v20  ;;  %v668_v42 = vld [vmem:[%s902_s3 + $0xe4] ss:$8 sps:$4 sm:$0xff]   ;;  %v670_v43 = vld [vmem:[%s902_s3 + $0xe0] ss:$8 sps:$4 sm:$0xff]   ;;  %v671_v44 = vld [vmem:[%s902_s3 + $0xf4] ss:$8 sps:$4 sm:$0xff]  }
   0xd   :  { %552 = vmatmul.mubr.msk.bf16.vlgmr.msra.gmra.mrb[0].mxu0 %vm65_vm1, %v28_v18  ;;  %v673_v45 = vld [vmem:[%s902_s3 + $0xf0] ss:$8 sps:$4 sm:$0xff]   ;;  %v674_v46 = vld [vmem:[%s904_s5 + $0x40] sm:$0xff]   ;;  %v676_v48 = vld [vmem:[%s904_s5 + $0x48] sm:$0xff]   ;;  %v34_v58 = vsub.s32 0, %v735_v5  ;;  %v38_v60 = vsub.s32 1, %v735_v5 }
   0xe   :  { %v675_v47 = vld [vmem:[%s904_s5] sm:$0xff]   ;;  %602 = vmatprep.subr.bf16.mxu0 %v674_v46  ;;  %v677_v49 = vld [vmem:[%s904_s5 + $0x8] sm:$0xff]   ;;  %v679_v51 = vld [vmem:[%s904_s5 + $0x10] sm:$0xff]  }
   0xf   :  { %332 = vmatpush1.bf16.msra.mxu1 %v637_v21  ;;  %603 = vmatpush3.bf16.msra.mxu0 %v675_v47  ;;  %v680_v52 = vld [vmem:[%s904_s5 + $0x58] sm:$0xff]   ;;  %v682_v54 = vld [vmem:[%s904_s5 + $0x60] sm:$0xff]   ;;  %v684_v56 = vld [vmem:[%s904_s5 + $0x68] sm:$0xff]  }
  0x10   :  { %333 = vmatprep.subr.bf16.mxu1 %v638_v22  ;;  %604 = vmatprep.subr.bf16.mxu0 %v676_v48  ;;  %v681_v53 = vld [vmem:[%s904_s5 + $0x18] sm:$0xff]   ;;  %v683_v55 = vld [vmem:[%s904_s5 + $0x20] sm:$0xff]   ;;  %v685_v57 = vld [vmem:[%s904_s5 + $0x28] sm:$0xff]  }
  0x11   :  { %v30_v59 = vld [vmem:[%s905_s2] sm:$0x3]  ;;  %v686_v10 = vld [vmem:[%s904_s5 + $0x70] sm:$0xff]   ;;  %v688_v11 = vld [vmem:[%s904_s5 + $0x78] sm:$0xff]  }
  0x12   :  { %v35_v61 = vrot.slane %v30_v59, %v34_v58  ;;  %v39_v62 = vrot.slane %v30_v59, %v38_v60  ;;  %v687_v5 = vld [vmem:[%s904_s5 + $0x30] sm:$0xff]   ;;  %v689_v12 = vld [vmem:[%s904_s5 + $0x38] sm:$0xff]   ;;  %v153_v13 = vld [vmem:[%s906_s4] sm:$0x3] }
  0x13   :  { %334 = vmatpush1.bf16.msra.mxu1 %v640_v23  ;;  %605 = vmatpush3.bf16.msra.mxu0 %v677_v49  ;;  %v158_v14 = vrot.slane %v153_v13, %v34_v58  ;;  %v162_v15 = vrot.slane %v153_v13, %v38_v60 }
  0x14   :  { %335 = vmatprep.subr.bf16.mxu1 %v641_v24  ;;  %606 = vmatprep.subr.bf16.mxu0 %v678_v50 }
  0x17   :  { %336 = vmatpush1.bf16.msra.mxu1 %v643_v25  ;;  %607 = vmatpush3.bf16.msra.mxu0 %v679_v51 }
  0x18   :  { %337 = vmatprep.subr.bf16.mxu1 %v644_v26  ;;  %608 = vmatprep.subr.bf16.mxu0 %v680_v52 }
  0x1b   :  { %338 = vmatpush1.bf16.msra.mxu1 %v646_v27  ;;  %609 = vmatpush3.bf16.msra.mxu0 %v681_v53  ;;  %v585_v27 = vld [vmem:[%s907_s6] ss:$0 sm:$0xff] }
  0x1c   :  { %339 = vmatprep.subr.bf16.mxu1 %v647_v28  ;;  %610 = vmatprep.subr.bf16.mxu0 %v682_v54 }
  0x1f   :  { %340 = vmatpush1.bf16.msra.mxu1 %v649_v29  ;;  %611 = vmatpush3.bf16.msra.mxu0 %v683_v55 }
  0x20   :  { %341 = vmatprep.subr.bf16.mxu1 %v650_v30  ;;  %612 = vmatprep.subr.bf16.mxu0 %v684_v56 }
  0x23   :  { %342 = vmatpush1.bf16.msra.mxu1 %v652_v31  ;;  %613 = vmatpush3.bf16.msra.mxu0 %v685_v57 }
  0x24   :  { %343 = vmatprep.subr.bf16.mxu1 %v653_v32  ;;  %614 = vmatprep.subr.bf16.mxu0 %v686_v10 }
  0x27   :  { %344 = vmatpush1.bf16.msra.mxu1 %v655_v33  ;;  %615 = vmatpush3.bf16.msra.mxu0 %v687_v5 }
  0x28   :  { %345 = vmatprep.subr.bf16.mxu1 %v656_v34  ;;  %616 = vmatprep.subr.bf16.mxu0 %v688_v11 }
  0x2b   :  { %346 = vmatpush1.bf16.msra.mxu1 %v658_v35  ;;  %617 = vmatpush3.bf16.msra.mxu0 %v689_v12 }
  0x2c   :  { %347 = vmatprep.subr.bf16.mxu1 %v659_v36 }
  0x2f   :  { %348 = vmatpush1.bf16.msra.mxu1 %v661_v37 }
  0x30   :  { %349 = vmatprep.subr.bf16.mxu1 %v662_v38 }
  0x33   :  { %350 = vmatpush1.bf16.msra.mxu1 %v664_v39 }
  0x34   :  { %351 = vmatprep.subr.bf16.mxu1 %v665_v40 }
  0x37   :  { %352 = vmatpush1.bf16.msra.mxu1 %v667_v41 }
  0x38   :  { %353 = vmatprep.subr.bf16.mxu1 %v668_v42 }
  0x3b   :  { %354 = vmatpush1.bf16.msra.mxu1 %v670_v43 }
  0x3c   :  { %355 = vmatprep.subr.bf16.mxu1 %v671_v44 }
  0x3f   :  { %356 = vmatpush1.bf16.msra.mxu1 %v673_v45 }
  0xe0   :  { %v110_v63 = vpop.f32.mrb[0].mxu0 }
  0xe1   :  { %v111_v0 = vadd.f32 %v110_v63, %v35_v61  ;;  %v112_v1 = vpop.f32.mrb[1].mxu0 }
  0xe2   :  { %v113_v2 = vadd.f32 %v112_v1, %v39_v62  ;;  %v114_v3 = vpop.f32.mrb[2].mxu0 }
  0xe3   :  { %v117_v4 = vmax.f32 %v111_v0, 0.0  ;;  %v115_v6 = vpop.f32.mrb[3].mxu0 }
  0xe4   :  { %v118_v7 = vmax.f32 %v113_v2, 0.0 }
  0xe5   :  { %v119_v9 = vpack.c.bf16 %v117_v4, %v117_v4 }
  0xe6   :  { %v120_v8 = vpack.c.bf16 %v118_v7, %v118_v7 }
  0xe8   :  { %357 = vmatprep.mubr.bf16.mxu1 %v120_v8 }
  0xe9   :  { %358 = vmatmul.mubr.bf16.vlgmr.msra.gmra.mrb[0].mxu1 %v119_v9 }
 0x1bc   :  { %v359_v16 = vpop.f32.mrb[0].mxu1 }
 0x1bd   :  { %v360_v17 = vadd.f32 %v359_v16, %v158_v14  ;;  %v361_v18 = vpop.f32.mrb[1].mxu1 }
 0x1be   :  { %v362_v19 = vadd.f32 %v361_v18, %v162_v15  ;;  %v363_v20 = vpop.f32.mrb[2].mxu1 }
 0x1bf   :  { %v366_v21 = vmax.f32 %v360_v17, 0.0  ;;  %v364_v22 = vpop.f32.mrb[3].mxu1 }
 0x1c0   :  { %v367_v23 = vmax.f32 %v362_v19, 0.0 }
 0x1c1   :  { %v368_v25 = vpack.c.bf16 %v366_v21, %v366_v21 }
 0x1c2   :  { %v369_v24 = vpack.c.bf16 %v367_v23, %v367_v23 }
 0x1c4   :  { %537 = vmatprep.mubr.bf16.mxu0 %v369_v24 }
 0x1c5   :  { %538 = vmatmul.mubr.bf16.vlgmr.msra.gmra.mrb[4].mxu0 %v368_v25 }
 0x298   :  { %v618_v26 = vpop.f32.mrb[4].mxu0 }
 0x299   :  { %v619_v28 = vpop.f32.mrb[5].mxu0 }
 0x29a   :  { %v620_v29 = vadd.f32 %v619_v28, %v618_v26  ;;  %v621_v30 = vpop.f32.mrb[6].mxu0 }
 0x29b   :  { %v622_v31 = vpop.f32.mrb[7].mxu0 }
 0x29c   :  { %v540_v32 = vadd.f32 %v620_v29, %v585_v27 }
 0x29e   :  { %545 = vst.msk [vmem:[%s908_s7] sm:$0xff] %vm65_vm1, %v540_v32 }

</bundles_post_ra>
